<compile_context>
chip_gen: v7x
topology: tpu7x:2x2x1
jax: 0.10.0
libtpu: 0.0.40
codegen_flags: <defaults>
</compile_context>

<pallas_src>
import math

import jax
import jax.numpy as jnp
from jax.experimental import pallas as pl
from jax.experimental.pallas import tpu as pltpu


def _round_up(a, b):
    return -(-a // b) * b


def _l21_kernel(x_ref, y_ref, o_ref, acc_ref):
    i = pl.program_id(0)
    j = pl.program_id(1)

    @pl.when((i == 0) & (j == 0))
    def _init():
        acc_ref[...] = jnp.zeros_like(acc_ref)
        o_ref[...] = jnp.zeros_like(o_ref)

    d = x_ref[0].astype(jnp.float32) - y_ref[0].astype(jnp.float32)  # (d1, tr)
    ssq = jnp.sum(d * d, axis=0, keepdims=True)                      # (1, tr)
    acc_ref[...] += jnp.sqrt(ssq)            # per-sample L2 norms, lane-dense

    @pl.when((i == pl.num_programs(0) - 1) & (j == pl.num_programs(1) - 1))
    def _finalize():
        o_ref[...] = jnp.sum(acc_ref[...], axis=1, keepdims=True)


def l21_loss(x, y, *, lane_tile=512):
    """PyTorch L21Loss.forward: sum over samples of ||x - y||_2 along dim 1."""
    assert x.shape == y.shape, "x and y must have the same shape"
    assert x.ndim >= 2, "norm is taken over dim 1"

    if x.ndim == 2:
        # (B, D): norm over D per row.  Present as (1, D, B) so the summed axis
        # (B) is lane-dense and D sits on sublanes.
        x3 = jnp.swapaxes(x, 0, 1)[None]
        y3 = jnp.swapaxes(y, 0, 1)[None]
    else:
        d0, d1 = x.shape[0], x.shape[1]
        rest = math.prod(x.shape[2:])
        x3 = x.reshape(d0, d1, rest)          # pure reshape of NCHW, no copy
        y3 = y.reshape(d0, d1, rest)

    x3 = x3.astype(jnp.float32)
    y3 = y3.astype(jnp.float32)
    d0, d1, rest = x3.shape

    # Lane tiling: pad the flattened trailing axis to a multiple of the tile.
    # Padded columns have x == y == 0 -> sqrt(0) = 0 -> no effect on the loss.
    tr = min(lane_tile, _round_up(rest, 128))
    restp = _round_up(rest, tr)
    if restp != rest:
        pad = restp - rest
        x3 = jnp.pad(x3, ((0, 0), (0, 0), (0, pad)))
        y3 = jnp.pad(y3, ((0, 0), (0, 0), (0, pad)))

    grid = (d0, restp // tr)
    # TODO(synk): also tile d1 (with an ssq accumulator) if the norm axis ever
    # gets large enough that a (1, d1, tr) block pressures VMEM.
    out = pl.pallas_call(
        _l21_kernel,
        out_shape=jax.ShapeDtypeStruct((1, 1), jnp.float32),
        grid_spec=pltpu.PrefetchScalarGridSpec(
            num_scalar_prefetch=0,
            grid=grid,
            in_specs=[
                pl.BlockSpec((1, d1, tr), lambda i, j: (i, 0, j)),
                pl.BlockSpec((1, d1, tr), lambda i, j: (i, 0, j)),
            ],
            out_specs=pl.BlockSpec((1, 1), lambda i, j: (0, 0)),
            scratch_shapes=[pltpu.VMEM((1, tr), jnp.float32)],
        ),
        compiler_params=pltpu.CompilerParams(
            dimension_semantics=("arbitrary", "arbitrary")),
    )(x3, y3)
    return out[0, 0]


if __name__ == "__main__":
    key = jax.random.PRNGKey(0)
    kx, ky = jax.random.split(key)
    x = jax.random.normal(kx, (2, 4, 16, 16), jnp.float32)
    y = jax.random.normal(ky, (2, 4, 16, 16), jnp.float32)

    loss = jax.jit(l21_loss)(x, y)
    jax.block_until_ready(loss)

    ref = jnp.sum(jnp.sqrt(jnp.sum((x - y) ** 2, axis=1)))
    assert loss.shape == ()
    assert bool(jnp.isfinite(loss))
    assert bool(jnp.allclose(loss, ref, rtol=1e-5, atol=1e-5)), (loss, ref)
    print("KERNEL_OK")
</pallas_src>

<mosaic_0001>
module attributes {stable_mosaic.version = 11 : i64} {
  func.func @_l21_kernel(%arg0: i32, %arg1: i32, %arg2: memref<1x4x256xf32, #tpu.memory_space<vmem>>, %arg3: memref<1x4x256xf32, #tpu.memory_space<vmem>>, %arg4: memref<1x1xf32, #tpu.memory_space<vmem>>, %arg5: memref<1x256xf32, #tpu.memory_space<vmem>>) attributes {dimension_semantics = [#tpu.dimension_semantics<arbitrary>, #tpu.dimension_semantics<arbitrary>], iteration_bounds = array<i64: 2, 1>, scalar_prefetch = 0 : i64, scratch_operands = 1 : i64, tpu.core_type = #tpu.core_type<tc>, window_params = [{transform_indices = @transform_0, window_bounds = array<i64: 1, 4, 256>}, {transform_indices = @transform_1, window_bounds = array<i64: 1, 4, 256>}, {pipeline_mode = #tpu.pipeline_mode<synchronous>, transform_indices = @transform_2, window_bounds = array<i64: 1, 1>}]} {
    %c0_i32 = arith.constant 0 : i32
    %0 = arith.cmpi eq, %arg0, %c0_i32 : i32
    %c0_i32_0 = arith.constant 0 : i32
    %1 = arith.cmpi eq, %arg1, %c0_i32_0 : i32
    %2 = arith.andi %0, %1 : i1
    %3 = arith.extui %2 : i1 to i32
    %c0_i32_1 = arith.constant 0 : i32
    %4 = arith.cmpi ne, %3, %c0_i32_1 : i32
    scf.if %4 {
      %cst_13 = arith.constant 0.000000e+00 : f32
      %22 = vector.broadcast %cst_13 : f32 to vector<1x256xf32>
      %c0_14 = arith.constant 0 : index
      %c0_15 = arith.constant 0 : index
      %23 = vector.load %arg5[%c0_14, %c0_15] : memref<1x256xf32, #tpu.memory_space<vmem>>, vector<1x256xf32>
      tpu.vector_store %arg5[%c0_14, %c0_15], %22 {strides = array<i32>} : memref<1x256xf32, #tpu.memory_space<vmem>>, vector<1x256xf32>,
      %cst_16 = arith.constant 0.000000e+00 : f32
      %24 = vector.broadcast %cst_16 : f32 to vector<1x1xf32>
      %c0_17 = arith.constant 0 : index
      %c0_18 = arith.constant 0 : index
      %25 = vector.load %arg4[%c0_17, %c0_18] : memref<1x1xf32, #tpu.memory_space<vmem>>, vector<1x1xf32>
      tpu.vector_store %arg4[%c0_17, %c0_18], %24 {strides = array<i32>} : memref<1x1xf32, #tpu.memory_space<vmem>>, vector<1x1xf32>,
    } else {
    }
    %c0 = arith.constant 0 : index
    %c0_2 = arith.constant 0 : index
    %c0_3 = arith.constant 0 : index
    %5 = vector.load %arg2[%c0, %c0_2, %c0_3] : memref<1x4x256xf32, #tpu.memory_space<vmem>>, vector<1x4x256xf32>
    %6 = vector.shape_cast %5 : vector<1x4x256xf32> to vector<4x256xf32>
    %c0_4 = arith.constant 0 : index
    %c0_5 = arith.constant 0 : index
    %c0_6 = arith.constant 0 : index
    %7 = vector.load %arg3[%c0_4, %c0_5, %c0_6] : memref<1x4x256xf32, #tpu.memory_space<vmem>>, vector<1x4x256xf32>
    %8 = vector.shape_cast %7 : vector<1x4x256xf32> to vector<4x256xf32>
    %9 = arith.subf %6, %8 : vector<4x256xf32>
    %10 = arith.mulf %9, %9 : vector<4x256xf32>
    %cst = arith.constant dense<0.000000e+00> : vector<256xf32>
    %11 = vector.multi_reduction <add>, %10, %cst [0] : vector<4x256xf32> to vector<256xf32>
    %12 = vector.shape_cast %11 : vector<256xf32> to vector<1x256xf32>
    %c0_7 = arith.constant 0 : index
    %c0_8 = arith.constant 0 : index
    %13 = vector.load %arg5[%c0_7, %c0_8] : memref<1x256xf32, #tpu.memory_space<vmem>>, vector<1x256xf32>
    %14 = math.sqrt %12 : vector<1x256xf32>
    %15 = arith.addf %13, %14 : vector<1x256xf32>
    %c0_9 = arith.constant 0 : index
    %c0_10 = arith.constant 0 : index
    %16 = vector.load %arg5[%c0_9, %c0_10] : memref<1x256xf32, #tpu.memory_space<vmem>>, vector<1x256xf32>
    tpu.vector_store %arg5[%c0_9, %c0_10], %15 {strides = array<i32>} : memref<1x256xf32, #tpu.memory_space<vmem>>, vector<1x256xf32>,
    %c1_i32 = arith.constant 1 : i32
    %17 = arith.cmpi eq, %arg0, %c1_i32 : i32
    %c0_i32_11 = arith.constant 0 : i32
    %18 = arith.cmpi eq, %arg1, %c0_i32_11 : i32
    %19 = arith.andi %17, %18 : i1
    %20 = arith.extui %19 : i1 to i32
    %c0_i32_12 = arith.constant 0 : i32
    %21 = arith.cmpi ne, %20, %c0_i32_12 : i32
    scf.if %21 {
      %c0_13 = arith.constant 0 : index
      %c0_14 = arith.constant 0 : index
      %22 = vector.load %arg5[%c0_13, %c0_14] : memref<1x256xf32, #tpu.memory_space<vmem>>, vector<1x256xf32>
      %cst_15 = arith.constant dense<0.000000e+00> : vector<1xf32>
      %23 = vector.multi_reduction <add>, %22, %cst_15 [1] : vector<1x256xf32> to vector<1xf32>
      %24 = vector.shape_cast %23 : vector<1xf32> to vector<1x1xf32>
      %c0_16 = arith.constant 0 : index
      %c0_17 = arith.constant 0 : index
      %25 = vector.load %arg4[%c0_16, %c0_17] : memref<1x1xf32, #tpu.memory_space<vmem>>, vector<1x1xf32>
      tpu.vector_store %arg4[%c0_16, %c0_17], %24 {strides = array<i32>} : memref<1x1xf32, #tpu.memory_space<vmem>>, vector<1x1xf32>,
    } else {
    }
    return
  }
  func.func @transform_0(%arg0: i32, %arg1: i32) -> (i32, i32, i32) {
    %c0_i32 = arith.constant 0 : i32
    %c0_i32_0 = arith.constant 0 : i32
    return %arg0, %c0_i32, %arg1 : i32, i32, i32
  }
  func.func @transform_1(%arg0: i32, %arg1: i32) -> (i32, i32, i32) {
    %c0_i32 = arith.constant 0 : i32
    %c0_i32_0 = arith.constant 0 : i32
    return %arg0, %c0_i32, %arg1 : i32, i32, i32
  }
  func.func @transform_2(%arg0: i32, %arg1: i32) -> (i32, i32) {
    %c0_i32 = arith.constant 0 : i32
    %c0_i32_0 = arith.constant 0 : i32
    %c0_i32_1 = arith.constant 0 : i32
    return %c0_i32, %c0_i32_0 : i32, i32
  }
}

</mosaic_0001>

<bundles_post_ra>
// kernel: l21_loss.1
= control target key start
LH: loop header
LB: loop body
LE: loop exit
PB: predicated region body
PF: predicated region fallthrough
CT: control target
= control target key end

     0   :  { %7 = vsyncpa [#allocation4], 0  ;;  %s499_s9 = smov 0   ;;  %s501_s10 = smov 0   ;;  %s569_s0 = inlined_call_operand.vmem [shape: f32[2,4,256], index: 0, kind: input, shape index: {}]   ;;  %s570_s1 = inlined_call_operand.vmem [shape: f32[2,4,256], index: 1, kind: input, shape index: {}]   ;;  %s571_s2 = inlined_call_operand.hbm [shape: f32[1,1], index: 2, kind: output, shape index: {}]  }
   0x1   :  { %s503_s11 = smov 0  }
   0x2 LB: > { %s372_s12 = sadd.s32 4294967295, %s479_s11   ;;  %s25_s13 = sadd.s32 1, %s475_s10  ;;  %s479_s11 = sphi %s503_s11, %s13_s11   ;;  %s475_s10 = sphi %s501_s10, %s574_s10   ;;  %s471_s9 = sphi %s499_s9, %s573_s9  }
   0x3   : > { %p27_p0 = scmp.ge.s32.totalorder %s25_s13, 2  ;;  %p375_p1 = scmp.ge.s32.totalorder %s479_s11, 1 }
   0x4   : > { %p144_p2 = scmp.lt.s32.totalorder %s479_s11, 3 }
   0x5   : > { %s576_s13 = smov (%p27_p0, %s25_s13), 0 }
   0x6   : > { %p145_p3 = pnand %p375_p1, %p144_p2 }
   0x7   : > { %p175_p4 = scmp.lt.s32.totalorder (!%p145_p3), %s471_s9, 1  ;;  %p194_p5 = scmp.eq.s32.totalorder (!%p145_p3), %s471_s9, 0 }
   0x8   : > { %148 = sbr.rel (%p145_p3) target bundleno = 248 (0xf8), region = 28 }
   0xf   : > { %s176_s14 = scalar_select %p175_p4, %s471_s9, 1 }
  0x10   : > { %199 = sbr.rel (!%p194_p5) target bundleno = 23 (0x17), region = 32  ;;  %v200_v0 = vlaneseq (%p194_p5)  ;;  %vm205_vm0 = vcmask (%p194_p5), 0   ;;  %v481_v1 = vmov (%p194_p5), 0.0  }
  0x11   : > { %s386_s15 = sshll.u32 %s176_s14, 3  ;;  %206 = vst.msk [vmem:[#allocation3] sm:$0x1] (%p194_p5), %vm205_vm0, %v481_v1 }
  0x12   : > { %s182_s18 = scalar_lea.vmem %s569_s0, %s386_s15  ;;  %s192_s21 = scalar_lea.vmem %s570_s1, %s386_s15  ;;  %vm202_vm1 = vcmp.lt.s32.totalorder (%p194_p5), %v200_v0, 256 }
  0x13   : > { %204 = vst.msk [vmem:[#allocation2] sm:$0x3] (%p194_p5), %vm202_vm1, %v481_v1 }
  0x17 PF: > { %v207_v2 = vld [vmem:[%s182_s18] sm:$0xff]  ;;  %p268_p6 = scmp.eq.s32.totalorder %s471_s9, 1  ;;  %vm214_vm2 = vcmask 1043456   ;;  %v482_v21 = vmov 1966171168   ;;  %v250_v23 = vlaneseq }
  0x18   : > { %v208_v3 = vld [vmem:[%s192_s21] sm:$0xff]  ;;  %v248_v22 = vunpack.c.l.s4 %v482_v21  ;;  %vm285_vm8 = vcmask (%p268_p6), 1040384   ;;  %vm291_vm9 = vcmask (%p268_p6), 0  }
  0x19   : > { %v209_v4 = vsub.f32 %v207_v2, %v208_v3  ;;  %v251_v28 = vshrl.u32 %v250_v23, 7  ;;  %vm265_vm7 = vcmp.lt.s32.totalorder %v250_v23, 256 }
  0x1a   : > { %v249_v27 = vunpack.c.0.s8 %v248_v22  ;;  %v229_v39 = vld [vmem:[#allocation2] sm:$0x3] }
  0x1b   : > { %v210_v5 = vmul.f32 %v209_v4, %v209_v4  ;;  %v277_v43 = vsub.s32 (%p268_p6), 0, %v251_v28  ;;  %v281_v44 = vsub.s32 (%p268_p6), 1, %v251_v28 }
  0x1c   : > { %v252_v35 = vsub.s32 %v249_v27, %v251_v28 }
  0x1d   : > { %v212_v6 = vcombine.high %v210_v5, %v210_v5  ;;  %v215_v7 = vsel %vm214_vm2, %v210_v5, 0.0 }
  0x1e   : > { %v216_v8 = vrot.slane %v215_v7, 4 }
  0x1f   : > { %v222_v9 = vsel %vm214_vm2, %v212_v6, 0.0 }
  0x20   : > { %v217_v10 = vadd.f32 %v216_v8, %v215_v7  ;;  %v223_v11 = vrot.slane %v222_v9, 4 }
  0x22   : > { %v218_v12 = vrot.slane %v217_v10, 2  ;;  %v224_v13 = vadd.f32 %v223_v11, %v222_v9 }
  0x24   : > { %v219_v14 = vadd.f32 %v218_v12, %v217_v10  ;;  %v225_v15 = vrot.slane %v224_v13, 2 }
  0x26   : > { %v220_v16 = vrot.slane %v219_v14, 1  ;;  %v226_v17 = vadd.f32 %v225_v15, %v224_v13 }
  0x28   : > { %v221_v18 = vadd.f32 %v220_v16, %v219_v14  ;;  %v227_v19 = vrot.slane %v226_v17, 1 }
  0x2a   : > { %v228_v20 = vadd.f32 %v227_v19, %v226_v17  ;;  %423 = vrsqrt.f32 %v221_v18  ;;  %vm232_vm3 = vcmp.eq.f32.partialorder %v221_v18, inf  ;;  %v235_v25 = vand.u32 2147483648, %v221_v18 }
  0x2b   : > { %vm234_vm4 = vcmp.eq.f32.partialorder %v221_v18, 0.0 }
  0x2c   : > { %425 = vrsqrt.f32 %v228_v20  ;;  %vm239_vm5 = vcmp.eq.f32.partialorder %v228_v20, inf  ;;  %v242_v30 = vand.u32 2147483648, %v228_v20  ;;  %vm241_vm6 = vcmp.eq.f32.partialorder %v228_v20, 0.0 }
  0x34   : > { %v424_v24 = vpop.eup %423 }
  0x35   : > { %v231_v26 = vmul.f32 %v424_v24, %v221_v18 }
  0x36   : > { %v426_v29 = vpop.eup %425 }
  0x37   : > { %v233_v31 = vsel %vm232_vm3, %v221_v18, %v231_v26  ;;  %v238_v32 = vmul.f32 %v426_v29, %v228_v20 }
  0x38   : > { %v236_v33 = vsel %vm234_vm4, %v235_v25, %v233_v31 }
  0x39   : > { %v240_v34 = vsel %vm239_vm5, %v228_v20, %v238_v32 }
  0x3a   : > { %v243_v36 = vsel %vm241_vm6, %v242_v30, %v240_v34 }
  0x3b   : > { %v246_v37 = vcombine.low %v236_v33, %v243_v36 }
  0x3d   : > { %v253_v38 = vrot.slane %v246_v37, %v252_v35  ;;  %272 = sbr.rel (!%p268_p6) target bundleno = 223 (0xdf), region = 36 }
  0x3f   : > { %v260_v40 = vrot.slane %v253_v38, %v252_v35 }
  0x41   : > { %v262_v41 = vadd.f32 %v260_v40, %v229_v39 }
  0x43   : > { %267 = vst.msk [vmem:[#allocation2] sm:$0x3] %vm265_vm7, %v262_v41 }
  0x4a   : > { %v273_v42 = vld [vmem:[#allocation2] sm:$0x3] }
  0x4b   : > { %v278_v45 = vrot.slane %v273_v42, %v277_v43  ;;  %v282_v46 = vrot.slane %v273_v42, %v281_v44 }
  0x4d   : > { %v286_v47 = vsel %vm285_vm8, %v278_v45, 0.0  ;;  %v287_v48 = vsel %vm285_vm8, %v282_v46, 0.0 }
  0x4e   : > { %v288_v49 = vadd.f32 %v287_v48, %v286_v47 }
  0x50   : > { %289 = vadd.xlane.f32.xlu0 %v288_v49 }
  0xdd   : > { %v290_v50 = vpop.xlane.xlu0 %289 }
  0xde   : > { %292 = vst.msk [vmem:[#allocation3] sm:$0x1] %vm291_vm9, %v290_v50 }
  0xdf PF: > { %p534_p7 = scmp.eq.s32.totalorder %s372_s12, 1  ;;  %s483_s23 = smov [#allocation3]  }
  0xe0   : > { %s300_s24 = sshll.u32 %s483_s23, 4  ;;  %s301_s24 = int_to_ptr.vmem [resolvable:$true] %s300_s24 }
  0xe1   : > { %s427_s25 = scalar_lea.vmem %s301_s24, 16  ;;  %s433_s26 = scalar_lea.vmem %s301_s24, 32 }
  0xe2   : > { %p428_p8 = scmp.ne.s32.totalorder %s301_s24, %s427_s25  ;;  %p434_p11 = scmp.lt.s32.totalorder %s301_s24, %s301_s24 }
  0xe3   : > { %p435_p12 = scmp.lt.s32.totalorder %s433_s26, %s427_s25 }
  0xe4   : > { %p429_p9 = pnand %p428_p8, %p534_p7 }
  0xe5   : > { %p436_p13 = por %p435_p12, %p434_p11 }
  0xe6   : > { %p430_p10 = pneg %p429_p9 }
  0xe8   : > { %p437_p0 = pnand %p436_p13, %p430_p10 }
  0xea   : > { %440 = shalt.err (!%p437_p0)
}
  0xeb   : > { %s441_s29 = scalar_lea.hbm %s571_s2, 16 }
  0xec   : > { %p442_p1 = scmp.ne.s32.totalorder %s571_s2, %s441_s29  ;;  %p447_p4 = scmp.lt.u32.totalorder %s441_s29, %s571_s2 }
  0xee   : > { %p443_p2 = pnand %p442_p1, %p534_p7 }
  0xf0   : > { %p444_p3 = pneg %p443_p2 }
  0xf2   : > { %p449_p5 = pnand %p447_p4, %p444_p3 }
  0xf4   : > { %452 = shalt.err (!%p449_p5)
}
  0xf5   : > { %391 = dma.vmem_to_hbm [thread:$0]  (%p534_p7), %s301_s24, 16, %s571_s2, [#allocation4]  }
  0xf6   : > { %466 = dma.done.wait (%p534_p7), [#allocation4], 16  }
  0xf7   : > { %468 = vsyncadd (%p534_p7), [#allocation4], 4294967280 }
  0xf8 PF: > { %s13_s11 = sadd.s32 1, %s479_s11   ;;  %s573_s9 = smov %s475_s10 }
  0xf9   : > { %p10_p6 = scmp.ge.s32.totalorder %s13_s11, 4   ;;  %s574_s10 = smov %s576_s13 }
  0xfb   :  { %12 = sbr.rel (!%p10_p6) target bundleno = 2 (0x2), region = 66 }
 0x102   :  { %313 = vsyncpa [#allocation4], 1 }
 0x103   :  { %315 = vsyncpa [#allocation4 + $0x1], 1 }

</bundles_post_ra>
